<compile_context>
chip_gen: v5e
topology: v5e:2x2
jax: 0.10.0
libtpu: 0.0.40
codegen_flags: <defaults>
</compile_context>

<pallas_src>
import math

import jax
import jax.numpy as jnp
from jax.experimental import pallas as pl
from jax.experimental.pallas import tpu as pltpu

_LANE = 128
_SUBLANE = 8
_ROW_ALIGN = 32           # dense native sublane tile for every dtype down to int8/fp8
_VMEM_LIMIT = 48 * 1024 * 1024   # fits v7x's 64 MiB VMEM, plenty on v5e/v6e


def _copy_kernel(x_ref, o_ref):
    # Dense, lane-packed full-block copy (unmasked vector stores). The vld/vst
    # work is free filler under the HBM DMA bound - nothing to optimize here.
    o_ref[...] = x_ref[...]


def _round_up(n, m):
    return -(-n // m) * m


def _pick_cols(n):
    """Largest lane-multiple divisor of n (<= 32768) leaving >= 8 rows; else the
    smallest lane-multiple divisor; None if n is not a multiple of 128."""
    cands = [c for c in (32768, 16384, 8192, 4096, 2048, 1024, 512, 256, 128)
             if n % c == 0]
    if not cands:
        return None
    for c in cands:
        if n // c >= _SUBLANE:
            return c
    return cands[-1]


def _rows_per_block(rows, cols, itemsize, block_bytes):
    """Row-block size: multiple of 32, ~block_bytes, and small enough that large
    tensors get >= 4 grid steps (so both v7x TensorCores participate)."""
    if rows <= 2 * _ROW_ALIGN:
        return rows                                   # tiny tensor: one full block
    cap = max(_ROW_ALIGN,
              (block_bytes // (cols * itemsize)) // _ROW_ALIGN * _ROW_ALIGN)
    quarter = _round_up(pl.cdiv(rows, 4), _ROW_ALIGN)  # aim for >= 4 grid steps
    return min(cap, quarter, rows)


def _dense(x, B, D, N, itemsize, cols, block_bytes):
    rows = N // cols
    rpb = _rows_per_block(rows, cols, itemsize, block_bytes)
    slab = x.reshape(rows, cols)                       # metadata-only reshape
    out = pl.pallas_call(
        _copy_kernel,
        out_shape=jax.ShapeDtypeStruct((rows, cols), x.dtype),
        grid=(pl.cdiv(rows, rpb),),
        in_specs=[pl.BlockSpec((rpb, cols), lambda i: (i, 0))],
        out_specs=pl.BlockSpec((rpb, cols), lambda i: (i, 0)),
        compiler_params=pltpu.CompilerParams(
            dimension_semantics=("parallel",),         # disjoint output rows per step
            vmem_limit_bytes=_VMEM_LIMIT,
        ),
        cost_estimate=pl.CostEstimate(
            flops=0, transcendentals=0, bytes_accessed=2 * N * itemsize),
        input_output_aliases={0: 0},                   # output buffer = input slab
    )(slab)
    return out.reshape(B, D)


def _ragged(x, B, D, N, itemsize, block_bytes):
    flat = x.reshape(B, D)
    # Full rows per block when a handful of rows fits the budget (contiguous DMA,
    # no per-row strided segments); otherwise lane-multiple column chunks.
    if _SUBLANE * D * itemsize <= block_bytes:
        d_blk = D
    else:
        d_blk = max(_LANE,
                    (block_bytes // (_SUBLANE * itemsize)) // _LANE * _LANE)
    rb = block_bytes // (d_blk * itemsize)             # rows that fit the budget
    if rb >= B:
        b_blk = B
    elif rb >= _ROW_ALIGN:
        b_blk = (rb // _ROW_ALIGN) * _ROW_ALIGN
    else:
        b_blk = _SUBLANE
    out = pl.pallas_call(
        _copy_kernel,
        out_shape=jax.ShapeDtypeStruct((B, D), x.dtype),
        grid=(pl.cdiv(B, b_blk), pl.cdiv(D, d_blk)),
        in_specs=[pl.BlockSpec((b_blk, d_blk), lambda i, j: (i, j))],
        out_specs=pl.BlockSpec((b_blk, d_blk), lambda i, j: (i, j)),
        compiler_params=pltpu.CompilerParams(
            dimension_semantics=("parallel", "parallel"),
            vmem_limit_bytes=_VMEM_LIMIT,
        ),
        cost_estimate=pl.CostEstimate(
            flops=0, transcendentals=0, bytes_accessed=2 * N * itemsize),
        input_output_aliases={0: 0},
    )(flat)
    return out


def flat_data(x, *, block_bytes=8 * 1024 * 1024):
    """Equivalent of PyTorch Flat_data.forward: (B, C, H, W) -> (B, C*H*W)."""
    B = x.shape[0]
    D = math.prod(x.shape[1:]) if x.ndim > 1 else 1
    N = B * D
    itemsize = jnp.dtype(x.dtype).itemsize

    cols = _pick_cols(N)
    if cols is not None:
        return _dense(x, B, D, N, itemsize, cols, block_bytes)
    return _ragged(x, B, D, N, itemsize, block_bytes)


if __name__ == "__main__":
    # Flat_data has no parameters, so nothing to initialize.
    key = jax.random.PRNGKey(0)
    x = jax.random.normal(key, (2, 4, 16, 16), dtype=jnp.float32)

    y = jax.jit(flat_data)(x)
    y = jax.block_until_ready(y)

    # Reference: torch's x.view(B, -1) == row-major reshape of a contiguous array.
    y_ref = x.reshape(x.shape[0], -1)
    assert y.shape == (2, 4 * 16 * 16), y.shape
    assert y.dtype == x.dtype
    assert jnp.array_equal(y, y_ref), "flatten mismatch vs reference reshape"

    print("KERNEL_OK")
</pallas_src>

<mosaic_0001>
module attributes {stable_mosaic.version = 11 : i64} {
  func.func @_copy_kernel(%arg0: i32, %arg1: memref<8x256xf32, #tpu.memory_space<vmem>>, %arg2: memref<8x256xf32, #tpu.memory_space<vmem>>) attributes {dimension_semantics = [#tpu.dimension_semantics<parallel>], iteration_bounds = array<i64: 1>, scalar_prefetch = 0 : i64, scratch_operands = 0 : i64, tpu.core_type = #tpu.core_type<tc>, window_params = [{transform_indices = @transform_0, window_bounds = array<i64: 8, 256>}, {transform_indices = @transform_1, window_bounds = array<i64: 8, 256>}]} {
    %c0 = arith.constant 0 : index
    %c0_0 = arith.constant 0 : index
    %0 = vector.load %arg1[%c0, %c0_0] : memref<8x256xf32, #tpu.memory_space<vmem>>, vector<8x256xf32>
    %c0_1 = arith.constant 0 : index
    %c0_2 = arith.constant 0 : index
    %1 = vector.load %arg2[%c0_1, %c0_2] : memref<8x256xf32, #tpu.memory_space<vmem>>, vector<8x256xf32>
    tpu.vector_store %arg2[%c0_1, %c0_2], %0 {strides = array<i32>} : memref<8x256xf32, #tpu.memory_space<vmem>>, vector<8x256xf32>,
    return
  }
  func.func @transform_0(%arg0: i32) -> (i32, i32) {
    %c0_i32 = arith.constant 0 : i32
    %c0_i32_0 = arith.constant 0 : i32
    return %arg0, %c0_i32 : i32, i32
  }
  func.func @transform_1(%arg0: i32) -> (i32, i32) {
    %c0_i32 = arith.constant 0 : i32
    %c0_i32_0 = arith.constant 0 : i32
    return %arg0, %c0_i32 : i32, i32
  }
}

</mosaic_0001>

<bundles_post_ra>
// kernel: flat_data.1
= control target key start
LH: loop header
LB: loop body
LE: loop exit
PB: predicated region body
PF: predicated region fallthrough
CT: control target
= control target key end

     0   :  { %s38_s0 = inlined_call_operand.vmem [shape: f32[8,256], index: 0, kind: input, shape index: {}, may-alias: {0,1}]   ;;  %s39_s1 = inlined_call_operand.vmem [shape: f32[8,256], index: 1, kind: output, shape index: {}, may-alias: {0,1}]  }
   0x1   :  { %v8_v0 = vld [vmem:[%s38_s0] sm:$0xff]  ;;  %v9_v1 = vld [vmem:[%s38_s0 + $0x8] sm:$0xff] }
   0x2   :  { %10 = vst [vmem:[%s39_s1] sm:$0xff] %v8_v0 }
   0x3   :  { %11 = vst [vmem:[%s39_s1 + $0x8] sm:$0xff] %v9_v1 }

</bundles_post_ra>
